<compile_context>
chip_gen: v6e
topology: v6e:2x2x1
jax: 0.10.0
libtpu: 0.0.40
codegen_flags: <defaults>
</compile_context>

<pallas_src>
import functools

import jax
import jax.numpy as jnp
from jax.experimental import pallas as pl
from jax.experimental.pallas import tpu as pltpu


_EPS = 1e-5  # nn.InstanceNorm1d default eps


def _convlayer_kernel(x_ref, w_ref, b_ref, o_ref, hpad_ref, *scratch,
                      kernel_size, padding, stride, lout):
    """Fused InstanceNorm1d -> SiLU -> Conv1d for a block of `bb` batches.

    x_ref:    (bb, L, Cin) f32          input block, channels-last
    w_ref:    (K*Cin, Cout) bf16        [im2col path] or (K, Cin, Cout) bf16
    b_ref:    (1, Cout) f32             conv bias
    o_ref:    (bb*lout, Cout) f32       output rows (already strided)
    hpad_ref: (bb, L+2*pad, Cin) bf16   scratch: zero-padded post-SiLU activation
    scratch:  optional (bb*lout, K*Cin) bf16 im2col slab (im2col path only)
    """
    slab_ref = scratch[0] if scratch else None
    bb, seq_len, c_in = x_ref.shape
    k_sz, pad = kernel_size, padding
    lpad = hpad_ref.shape[1]

    # ---- InstanceNorm1d (biased variance over L, per batch & channel) + SiLU, f32.
    xv = x_ref[...].astype(jnp.float32)
    mu = jnp.mean(xv, axis=1, keepdims=True)
    xc = xv - mu
    var = jnp.mean(xc * xc, axis=1, keepdims=True)
    h = xc * jax.lax.rsqrt(var + _EPS)
    h = h * jax.nn.sigmoid(h)                       # SiLU
    h = h.astype(jnp.bfloat16)                      # early bf16 cast (before im2col)

    # ---- Zero-padded activation in VMEM scratch (pads zeroed, interior in place).
    if pad > 0:
        hpad_ref[:, :pad, :] = jnp.zeros((bb, pad, c_in), jnp.bfloat16)
        hpad_ref[:, pad + seq_len:, :] = jnp.zeros(
            (bb, lpad - pad - seq_len, c_in), jnp.bfloat16)
    hpad_ref[:, pad:pad + seq_len, :] = h

    def tap(k):
        """Rows of the padded activation feeding conv tap k: (bb*lout, Cin) bf16."""
        if stride == 1:
            t = hpad_ref[:, k:k + lout, :]
        else:
            t = hpad_ref[:, pl.ds(k, lout, stride=stride), :]
        return t.reshape(bb * lout, c_in)

    if slab_ref is not None:
        # im2col: K lane-aligned writes into the slab, then ONE deep MXU matmul.
        for k in range(k_sz):
            slab_ref[:, k * c_in:(k + 1) * c_in] = tap(k)
        acc = jnp.dot(slab_ref[...], w_ref[...], preferred_element_type=jnp.float32)
    else:
        # K accumulated matmuls (Cin not lane-aligned: avoids masked lane packing).
        acc = jnp.dot(tap(0), w_ref[0], preferred_element_type=jnp.float32)
        for k in range(1, k_sz):
            acc = acc + jnp.dot(tap(k), w_ref[k], preferred_element_type=jnp.float32)

    o_ref[...] = acc + b_ref[...]


def _vmem_budget():
    """(per-block VMEM budget bytes, scoped vmem_limit_bytes) for this TPU gen."""
    kind = ""
    try:
        kind = jax.devices()[0].device_kind.lower()
    except Exception:
        pass
    if "v5" in kind or "v6" in kind:
        return 32 << 20, 96 << 20      # v5e/v6e: 128 MiB physical VMEM per core
    return 20 << 20, 48 << 20          # v7x (64 MiB physical VMEM) and unknown chips


def _pick_batch_block(batch, per_batch_bytes, rows_per_batch, budget_bytes):
    """Largest divisor `bb` of `batch` whose block fits `budget_bytes`, keeps the
    output block sublane-aligned (bb*rows % 8 == 0), and leaves grid >= 2 so both
    v7x TensorCores get work (free on single-core v5e/v6e)."""
    cap = batch if batch < 2 else batch // 2
    legal = [bb for bb in range(1, cap + 1)
             if batch % bb == 0 and (bb * rows_per_batch) % 8 == 0]
    if not legal:
        # No aligned sub-block exists; the full-array block is always layout-legal.
        # TODO(synk): split the L axis instead if this full block exceeds VMEM.
        return batch
    fits = [bb for bb in legal if bb * per_batch_bytes <= budget_bytes]
    if fits:
        return max(fits)
    # Nothing fits the budget: smallest legal block (fails loudly at compile time
    # if even that spills).
    # TODO(synk): split the L axis for very long sequences instead of shrinking bb.
    return min(legal)


def conv_layer(x, weight, bias, *, stride=1, padding=0, interpret=False):
    """ConvLayer forward: InstanceNorm1d -> SiLU -> Conv1d.

    x:      (B, Cin, L)    float32, PyTorch NCL layout
    weight: (Cout, Cin, K) float32, PyTorch Conv1d weight
    bias:   (Cout,)        float32
    returns (B, Cout, Lout) float32, Lout = (L + 2*padding - K)//stride + 1
    """
    B, c_in, L = x.shape
    c_out, _, K = weight.shape
    lout = (L + 2 * padding - K) // stride + 1
    lpad = L + 2 * padding

    # TODO(synk): these two transposes are full HBM round-trips; keep activations
    # channels-last across the surrounding model to drop them.
    x_lc = jnp.transpose(x, (0, 2, 1))                                 # (B, L, Cin)

    use_im2col = (c_in % 128 == 0)   # lane-aligned taps -> single deep matmul
    if use_im2col:
        w_k = jnp.transpose(weight, (2, 1, 0)).reshape(K * c_in, c_out)
        w_k = w_k.astype(jnp.bfloat16)                                 # [k*Cin+ci, co]
        w_spec = pl.BlockSpec((K * c_in, c_out), lambda i: (0, 0))
    else:
        w_k = jnp.transpose(weight, (2, 1, 0)).astype(jnp.bfloat16)    # (K, Cin, Cout)
        w_spec = pl.BlockSpec((K, c_in, c_out), lambda i: (0, 0, 0))
    b2 = bias.reshape(1, c_out).astype(jnp.float32)

    budget, vmem_limit = _vmem_budget()
    w_bytes = 2 * (w_k.size * 2 + c_out * 4)           # resident weights + bias
    slab_bytes = (K if use_im2col else 1) * lout * c_in * 2
    per_batch = (2 * L * c_in * 4                      # input block (double-buffered)
                 + 2 * lout * c_out * 4                # output block (double-buffered)
                 + lpad * c_in * 2                     # padded bf16 scratch
                 + 2 * L * c_in * 4                    # f32 temporaries (xc, h)
                 + lout * c_out * 4                    # f32 accumulator value
                 + slab_bytes)                         # bf16 im2col slab / tap
    bb = _pick_batch_block(B, per_batch, lout, max(budget - w_bytes, 0))

    scratch = [pltpu.VMEM((bb, lpad, c_in), jnp.bfloat16)]
    if use_im2col:
        scratch.append(pltpu.VMEM((bb * lout, K * c_in), jnp.bfloat16))

    kernel = functools.partial(_convlayer_kernel, kernel_size=K, padding=padding,
                               stride=stride, lout=lout)
    y = pl.pallas_call(
        kernel,
        out_shape=jax.ShapeDtypeStruct((B * lout, c_out), jnp.float32),
        grid=(B // bb,),
        in_specs=[
            pl.BlockSpec((bb, L, c_in), lambda i: (i, 0, 0)),
            w_spec,                                    # weights stay resident
            pl.BlockSpec((1, c_out), lambda i: (0, 0)),
        ],
        out_specs=pl.BlockSpec((bb * lout, c_out), lambda i: (i, 0)),
        scratch_shapes=scratch,
        compiler_params=pltpu.CompilerParams(
            dimension_semantics=("parallel",),
            vmem_limit_bytes=vmem_limit),
        interpret=interpret,
    )(x_lc, w_k, b2)

    y = y.reshape(B, lout, c_out)
    return jnp.transpose(y, (0, 2, 1))                                 # (B, Cout, Lout)


def conv_layer_ref(x, weight, bias, *, stride=1, padding=0):
    """Pure-JAX reference (f32) of ConvLayer.forward."""
    mu = jnp.mean(x, axis=2, keepdims=True)
    var = jnp.mean(jnp.square(x - mu), axis=2, keepdims=True)
    h = (x - mu) / jnp.sqrt(var + _EPS)
    h = h * jax.nn.sigmoid(h)
    y = jax.lax.conv_general_dilated(
        h, weight, window_strides=(stride,), padding=[(padding, padding)],
        dimension_numbers=("NCH", "OIH", "NCH"))
    return y + bias[None, :, None]


def _check(key, *, B, c_in, c_out, L, K, stride, padding):
    kw, kb, kx = jax.random.split(key, 3)
    weight = jax.random.normal(kw, (c_out, c_in, K), jnp.float32) / ((c_in * K) ** 0.5)
    bias = 0.1 * jax.random.normal(kb, (c_out,), jnp.float32)
    x = jax.random.normal(kx, (B, c_in, L), jnp.float32)

    fwd = jax.jit(functools.partial(conv_layer, stride=stride, padding=padding))
    y = fwd(x, weight, bias)
    jax.block_until_ready(y)

    lout = (L + 2 * padding - K) // stride + 1
    assert y.shape == (B, c_out, lout) and y.dtype == jnp.float32
    y_ref = conv_layer_ref(x, weight, bias, stride=stride, padding=padding)
    err = float(jnp.max(jnp.abs(y - y_ref)))
    assert err < 5e-2, f"max abs error too large: {err}"


if __name__ == "__main__":
    key = jax.random.PRNGKey(0)
    k1, k2 = jax.random.split(key)
    # K-accumulated-matmul path (Cin not a multiple of 128).
    _check(k1, B=2, c_in=32, c_out=128, L=64, K=3, stride=1, padding=1)
    # im2col single-matmul path (Cin lane-aligned).
    _check(k2, B=2, c_in=128, c_out=128, L=64, K=3, stride=1, padding=1)
    print("KERNEL_OK")
</pallas_src>

<mosaic_0001>
module attributes {stable_mosaic.version = 11 : i64} {
  func.func @_convlayer_kernel(%arg0: i32, %arg1: memref<1x64x32xf32, #tpu.memory_space<vmem>>, %arg2: memref<3x32x128xbf16, #tpu.memory_space<vmem>>, %arg3: memref<1x128xf32, #tpu.memory_space<vmem>>, %arg4: memref<64x128xf32, #tpu.memory_space<vmem>>, %arg5: memref<1x66x32xbf16, #tpu.memory_space<vmem>>) attributes {dimension_semantics = [#tpu.dimension_semantics<parallel>], iteration_bounds = array<i64: 2>, scalar_prefetch = 0 : i64, scratch_operands = 1 : i64, tpu.core_type = #tpu.core_type<tc>, window_params = [{transform_indices = @transform_0, window_bounds = array<i64: 1, 64, 32>}, {pipeline_mode = #tpu.pipeline_mode<synchronous>, transform_indices = @transform_1, window_bounds = array<i64: 3, 32, 128>}, {pipeline_mode = #tpu.pipeline_mode<synchronous>, transform_indices = @transform_2, window_bounds = array<i64: 1, 128>}, {transform_indices = @transform_3, window_bounds = array<i64: 64, 128>}]} {
    %c0 = arith.constant 0 : index
    %c0_0 = arith.constant 0 : index
    %c0_1 = arith.constant 0 : index
    %0 = vector.load %arg1[%c0, %c0_0, %c0_1] : memref<1x64x32xf32, #tpu.memory_space<vmem>>, vector<1x64x32xf32>
    %cst = arith.constant dense<0.000000e+00> : vector<1x32xf32>
    %1 = vector.multi_reduction <add>, %0, %cst [1] : vector<1x64x32xf32> to vector<1x32xf32>
    %2 = vector.shape_cast %1 : vector<1x32xf32> to vector<1x1x32xf32>
    %cst_2 = arith.constant 6.400000e+01 : f32
    %3 = vector.broadcast %cst_2 : f32 to vector<1x1x32xf32>
    %4 = arith.divf %2, %3 : vector<1x1x32xf32>
    %5 = vector.broadcast %4 : vector<1x1x32xf32> to vector<1x64x32xf32>
    %6 = arith.subf %0, %5 : vector<1x64x32xf32>
    %7 = arith.mulf %6, %6 : vector<1x64x32xf32>
    %cst_3 = arith.constant dense<0.000000e+00> : vector<1x32xf32>
    %8 = vector.multi_reduction <add>, %7, %cst_3 [1] : vector<1x64x32xf32> to vector<1x32xf32>
    %9 = vector.shape_cast %8 : vector<1x32xf32> to vector<1x1x32xf32>
    %cst_4 = arith.constant 6.400000e+01 : f32
    %10 = vector.broadcast %cst_4 : f32 to vector<1x1x32xf32>
    %11 = arith.divf %9, %10 : vector<1x1x32xf32>
    %cst_5 = arith.constant 9.99999974E-6 : f32
    %12 = vector.broadcast %cst_5 : f32 to vector<1x1x32xf32>
    %13 = arith.addf %11, %12 : vector<1x1x32xf32>
    %14 = math.rsqrt %13 : vector<1x1x32xf32>
    %15 = vector.broadcast %14 : vector<1x1x32xf32> to vector<1x64x32xf32>
    %16 = arith.mulf %6, %15 : vector<1x64x32xf32>
    %17 = arith.negf %16 : vector<1x64x32xf32>
    %18 = math.exp %17 : vector<1x64x32xf32>
    %cst_6 = arith.constant 1.000000e+00 : f32
    %19 = vector.broadcast %cst_6 : f32 to vector<1x64x32xf32>
    %20 = arith.addf %19, %18 : vector<1x64x32xf32>
    %21 = arith.divf %19, %20 : vector<1x64x32xf32>
    %22 = arith.mulf %16, %21 : vector<1x64x32xf32>
    %23 = arith.truncf %22 : vector<1x64x32xf32> to vector<1x64x32xbf16>
    %cst_7 = arith.constant 0.000000e+00 : bf16
    %24 = vector.broadcast %cst_7 : bf16 to vector<1x1x32xbf16>
    %c0_8 = arith.constant 0 : index
    %c0_9 = arith.constant 0 : index
    %c0_10 = arith.constant 0 : index
    %25 = vector.load %arg5[%c0_8, %c0_9, %c0_10] : memref<1x66x32xbf16, #tpu.memory_space<vmem>>, vector<1x1x32xbf16>
    tpu.vector_store %arg5[%c0_8, %c0_9, %c0_10], %24 {strides = array<i32>} : memref<1x66x32xbf16, #tpu.memory_space<vmem>>, vector<1x1x32xbf16>,
    %cst_11 = arith.constant 0.000000e+00 : bf16
    %26 = vector.broadcast %cst_11 : bf16 to vector<1x1x32xbf16>
    %c0_12 = arith.constant 0 : index
    %c65 = arith.constant 65 : index
    %c0_13 = arith.constant 0 : index
    %27 = vector.load %arg5[%c0_12, %c65, %c0_13] : memref<1x66x32xbf16, #tpu.memory_space<vmem>>, vector<1x1x32xbf16>
    tpu.vector_store %arg5[%c0_12, %c65, %c0_13], %26 {strides = array<i32>} : memref<1x66x32xbf16, #tpu.memory_space<vmem>>, vector<1x1x32xbf16>,
    %c0_14 = arith.constant 0 : index
    %c1 = arith.constant 1 : index
    %c0_15 = arith.constant 0 : index
    %28 = vector.load %arg5[%c0_14, %c1, %c0_15] : memref<1x66x32xbf16, #tpu.memory_space<vmem>>, vector<1x64x32xbf16>
    tpu.vector_store %arg5[%c0_14, %c1, %c0_15], %23 {strides = array<i32>} : memref<1x66x32xbf16, #tpu.memory_space<vmem>>, vector<1x64x32xbf16>,
    %c0_16 = arith.constant 0 : index
    %c0_17 = arith.constant 0 : index
    %c0_18 = arith.constant 0 : index
    %29 = vector.load %arg5[%c0_16, %c0_17, %c0_18] : memref<1x66x32xbf16, #tpu.memory_space<vmem>>, vector<1x64x32xbf16>
    %30 = vector.shape_cast %29 : vector<1x64x32xbf16> to vector<64x32xbf16>
    %c0_19 = arith.constant 0 : index
    %c0_20 = arith.constant 0 : index
    %c0_21 = arith.constant 0 : index
    %31 = vector.load %arg2[%c0_19, %c0_20, %c0_21] : memref<3x32x128xbf16, #tpu.memory_space<vmem>>, vector<1x32x128xbf16>
    %32 = vector.shape_cast %31 : vector<1x32x128xbf16> to vector<32x128xbf16>
    %cst_22 = arith.constant dense<0.000000e+00> : vector<64x128xf32>
    %33 = tpu.matmul %30, %32, %cst_22 {dimension_numbers = #tpu.dot_dimension_numbers<[1], [0], [0], [1], [0, 0, 1, 1], [], []>} : vector<64x32xbf16>, vector<32x128xbf16>, vector<64x128xf32> -> vector<64x128xf32>
    %c0_23 = arith.constant 0 : index
    %c1_24 = arith.constant 1 : index
    %c0_25 = arith.constant 0 : index
    %34 = vector.load %arg5[%c0_23, %c1_24, %c0_25] : memref<1x66x32xbf16, #tpu.memory_space<vmem>>, vector<1x64x32xbf16>
    %35 = vector.shape_cast %34 : vector<1x64x32xbf16> to vector<64x32xbf16>
    %c1_26 = arith.constant 1 : index
    %c0_27 = arith.constant 0 : index
    %c0_28 = arith.constant 0 : index
    %36 = vector.load %arg2[%c1_26, %c0_27, %c0_28] : memref<3x32x128xbf16, #tpu.memory_space<vmem>>, vector<1x32x128xbf16>
    %37 = vector.shape_cast %36 : vector<1x32x128xbf16> to vector<32x128xbf16>
    %cst_29 = arith.constant dense<0.000000e+00> : vector<64x128xf32>
    %38 = tpu.matmul %35, %37, %cst_29 {dimension_numbers = #tpu.dot_dimension_numbers<[1], [0], [0], [1], [0, 0, 1, 1], [], []>} : vector<64x32xbf16>, vector<32x128xbf16>, vector<64x128xf32> -> vector<64x128xf32>
    %39 = arith.addf %33, %38 : vector<64x128xf32>
    %c0_30 = arith.constant 0 : index
    %c2 = arith.constant 2 : index
    %c0_31 = arith.constant 0 : index
    %40 = vector.load %arg5[%c0_30, %c2, %c0_31] : memref<1x66x32xbf16, #tpu.memory_space<vmem>>, vector<1x64x32xbf16>
    %41 = vector.shape_cast %40 : vector<1x64x32xbf16> to vector<64x32xbf16>
    %c2_32 = arith.constant 2 : index
    %c0_33 = arith.constant 0 : index
    %c0_34 = arith.constant 0 : index
    %42 = vector.load %arg2[%c2_32, %c0_33, %c0_34] : memref<3x32x128xbf16, #tpu.memory_space<vmem>>, vector<1x32x128xbf16>
    %43 = vector.shape_cast %42 : vector<1x32x128xbf16> to vector<32x128xbf16>
    %cst_35 = arith.constant dense<0.000000e+00> : vector<64x128xf32>
    %44 = tpu.matmul %41, %43, %cst_35 {dimension_numbers = #tpu.dot_dimension_numbers<[1], [0], [0], [1], [0, 0, 1, 1], [], []>} : vector<64x32xbf16>, vector<32x128xbf16>, vector<64x128xf32> -> vector<64x128xf32>
    %45 = arith.addf %39, %44 : vector<64x128xf32>
    %c0_36 = arith.constant 0 : index
    %c0_37 = arith.constant 0 : index
    %46 = vector.load %arg3[%c0_36, %c0_37] : memref<1x128xf32, #tpu.memory_space<vmem>>, vector<1x128xf32>
    %47 = vector.broadcast %46 : vector<1x128xf32> to vector<64x128xf32>
    %48 = arith.addf %45, %47 : vector<64x128xf32>
    %c0_38 = arith.constant 0 : index
    %c0_39 = arith.constant 0 : index
    %49 = vector.load %arg4[%c0_38, %c0_39] : memref<64x128xf32, #tpu.memory_space<vmem>>, vector<64x128xf32>
    tpu.vector_store %arg4[%c0_38, %c0_39], %48 {strides = array<i32>} : memref<64x128xf32, #tpu.memory_space<vmem>>, vector<64x128xf32>,
    return
  }
  func.func @transform_0(%arg0: i32) -> (i32, i32, i32) {
    %c0_i32 = arith.constant 0 : i32
    %c0_i32_0 = arith.constant 0 : i32
    %c0_i32_1 = arith.constant 0 : i32
    return %arg0, %c0_i32, %c0_i32_0 : i32, i32, i32
  }
  func.func @transform_1(%arg0: i32) -> (i32, i32, i32) {
    %c0_i32 = arith.constant 0 : i32
    %c0_i32_0 = arith.constant 0 : i32
    %c0_i32_1 = arith.constant 0 : i32
    %c0_i32_2 = arith.constant 0 : i32
    return %c0_i32, %c0_i32_0, %c0_i32_1 : i32, i32, i32
  }
  func.func @transform_2(%arg0: i32) -> (i32, i32) {
    %c0_i32 = arith.constant 0 : i32
    %c0_i32_0 = arith.constant 0 : i32
    %c0_i32_1 = arith.constant 0 : i32
    return %c0_i32, %c0_i32_0 : i32, i32
  }
  func.func @transform_3(%arg0: i32) -> (i32, i32) {
    %c0_i32 = arith.constant 0 : i32
    %c0_i32_0 = arith.constant 0 : i32
    return %arg0, %c0_i32 : i32, i32
  }
}

</mosaic_0001>

<bundles_post_ra>
// kernel: conv_layer.1
= control target key start
LH: loop header
LB: loop body
LE: loop exit
PB: predicated region body
PF: predicated region fallthrough
CT: control target
= control target key end

     0   :  { %8 = vsyncpa [#allocation4], 0  ;;  %s1448_s0 = inlined_call_operand.vmem [shape: f32[2,64,32], index: 0, kind: input, shape index: {}]   ;;  %s1449_s1 = inlined_call_operand.vmem [shape: bf16[3,32,128], index: 1, kind: input, shape index: {}]   ;;  %s1450_s2 = inlined_call_operand.vmem [shape: f32[1,128], index: 2, kind: input, shape index: {}]   ;;  %s1451_s3 = inlined_call_operand.hbm [shape: f32[128,128], index: 3, kind: output, shape index: {}]  }
   0x1   :  { %10 = vsyncpa [#allocation4 + $0x1], 0  ;;  %s1207_s12 = smov 0   ;;  %s1209_s13 = smov 0  }
   0x2   :  { %s1211_s14 = smov 0   ;;  %s1213_s15 = smov 0  }
   0x3 LB: > { %s1228_s16 = sadd.s32 4294967295, %s1182_s15   ;;  %s907_s17 = sadd.s32 4294967294, %s1182_s15   ;;  %s1182_s15 = sphi %s1213_s15, %s1463_s15   ;;  %s1178_s14 = sphi %s1211_s14, %s1462_s14   ;;  %s1174_s13 = sphi %s1209_s13, %s1461_s13   ;;  %s1170_s12 = sphi %s1207_s12, %s1460_s12  }
   0x4   : > { %s1232_s18 = sadd.s32 1, %s1182_s15   ;;  %s91_s19 = sadd.s32 1, %s1178_s14 }
   0x5   : > { %s88_s20 = ssub.s32 %s1182_s15, %s1232_s18  ;;  %p101_p0 = scmp.ne.s32.totalorder %s1178_s14, %s1174_s13 }
   0x6   : > { %p89_p1 = scmp.eq.s32.totalorder %s88_s20, 0  ;;  %p102_p2 = scmp.eq.s32.totalorder %s1228_s16, 1 }
   0x7   : > { %p107_p3 = scmp.ne.s32.totalorder %s1174_s13, %s1170_s12  ;;  %p108_p4 = scmp.eq.s32.totalorder %s907_s17, 1 }
   0x8   : > { %s1243_s21 = scalar_select %p89_p1, %s1178_s14, %s91_s19  }
   0x9   : > { %p1245_p5 = por %p102_p2, %p101_p0  ;;  %p1249_p6 = por %p108_p4, %p107_p3 }
   0xa   : > { %p910_p7 = scmp.ge.s32.totalorder %s1182_s15, 1  ;;  %p140_p8 = scmp.lt.s32.totalorder %s1182_s15, 3 }
   0xc   : > { %p141_p9 = pnand %p910_p7, %p140_p8 }
   0xd   : > { %p164_p10 = scmp.lt.s32.totalorder (!%p141_p9), %s1228_s16, 1  ;;  %s161_s20 = sand.u32 (!%p141_p9), 1, %s1174_s13  }
   0xe   : > { %144 = sbr.rel (%p141_p9) target bundleno = 408 (0x198), region = 32  ;;  %s911_s24 = sshll.u32 (!%p141_p9), %s161_s20, 6 }
   0xf   : > { %s1387_s27 = scalar_lea.vmem (!%p141_p9), [#allocation3], %s911_s24  ;;  %s1408_s6 = scalar_lea.sflag (!%p141_p9), [#allocation4], %s161_s20 }
  0x10   : > { %s1184_s7 = smov (!%p141_p9), [#allocation3]  }
  0x11   : > { %s1126_s8 = sshll.u32 (!%p141_p9), %s1184_s7, 4  ;;  %s1127_s8 = int_to_ptr.vmem [resolvable:$false] %s1126_s8 }
  0x12   : > { %s1128_s9 = scalar_lea.vmem (!%p141_p9), %s1127_s8, 2048 }
  0x13   : > { %v1077_v0 = vld [vmem:[%s1449_s1 + $0x18] sm:$0xff]   ;;  %v1078_v1 = vld [vmem:[%s1449_s1 + $0x10] sm:$0xff]   ;;  %s165_s28 = scalar_select %p164_p10, %s1228_s16, 1  ;;  %vm311_vm0 = vcmask 253952   ;;  %vm312_vm1 = vsmask.f32 256 }
  0x14   : > { %1032 = vmatprep.subr.bf16.mxu1 %v1077_v0  ;;  %996 = vmatprep.subr.bf16.mxu0 %v1077_v0  ;;  %v314_v2 = vld [vmem:[#allocation2] sm:$0x1]  ;;  %vm179_vm2 = vcmask 261120   ;;  %vm1265_vm3 = vmand %vm311_vm0, %vm312_vm1  ;;  %vm317_vm4 = vsmask.f32 7938  ;;  %v1287_v33 = vld [vmem:[%s1449_s1 + $0x8] sm:$0xff]  }
  0x15   : > { %1034 = vmatpush3.bf16.msra.mxu1 %v1077_v0  ;;  %997 = vmatpush3.bf16.msra.mxu0 %v1077_v0  ;;  %s968_s29 = sshll.u32 %s165_s28, 6  ;;  %v315_v4 = vsel %vm1265_vm3, 0, %v314_v2  ;;  %v319_v5 = vld [vmem:[#allocation2 + $0x20] sm:$0x1]  ;;  %vm318_vm5 = vmand %vm311_vm0, %vm317_vm4  ;;  %v1292_v35 = vld [vmem:[%s1449_s1 + $0x28] sm:$0xff]   ;;  %vm424_vm7 = vcmask 257024  }
  0x16   : > { %1033 = vmatprep.subr.bf16.mxu1 %v1078_v1  ;;  %998 = vmatprep.subr.bf16.mxu0 %v1078_v1  ;;  %s168_s5 = scalar_lea.vmem %s1448_s0, %s968_s29  ;;  %316 = vst [vmem:[#allocation2] sm:$0x1] %v315_v4  ;;  %v320_v17 = vsel %vm318_vm5, 0, %v319_v5  ;;  %vm342_vm6 = vsmask.f32 4368  ;;  %vm1317_vm8 = vmand %vm424_vm7, %vm317_vm4  ;;  %vm701_vm11 = vcmask 1046528  }
  0x17   : > { %v171_v6 = vld [vmem:[%s168_s5] sm:$0xff]  ;;  %v172_v7 = vld [vmem:[%s168_s5 + $0x8] sm:$0xff]  ;;  %v173_v8 = vld [vmem:[%s168_s5 + $0x10] sm:$0xff]  ;;  %321 = vst [vmem:[#allocation2 + $0x20] sm:$0x1] %v320_v17  ;;  %s977_s28 = sshll.u32 %s1228_s16, 10 }
  0x18   : > { %v174_v9 = vld [vmem:[%s168_s5 + $0x18] sm:$0xff]  ;;  %v180_v10 = vsel %vm179_vm2, %v171_v6, 0.0  ;;  %v181_v11 = vsel %vm179_vm2, %v172_v7, 0.0  ;;  %v183_v12 = vsel %vm179_vm2, %v173_v8, 0.0  ;;  %v175_v13 = vld [vmem:[%s168_s5 + $0x20] sm:$0xff]  ;;  %v176_v15 = vld [vmem:[%s168_s5 + $0x28] sm:$0xff] }
  0x19   : > { %1035 = vmatpush3.bf16.msra.mxu1 %v1078_v1  ;;  %999 = vmatpush3.bf16.msra.mxu0 %v1078_v1  ;;  %v182_v14 = vadd.f32 %v181_v11, %v180_v10  ;;  %v185_v16 = vsel %vm179_vm2, %v174_v9, 0.0  ;;  %v187_v19 = vsel %vm179_vm2, %v175_v13, 0.0  ;;  %v177_v20 = vld [vmem:[%s168_s5 + $0x30] sm:$0xff]  ;;  %v189_v22 = vsel %vm179_vm2, %v176_v15, 0.0  ;;  %v178_v23 = vld [vmem:[%s168_s5 + $0x38] sm:$0xff]  ;;  %vm1324_vm9 = vmor %vm312_vm1, %vm342_vm6  ;;  %s845_s29 = sshll.u32 %s1387_s27, 4  ;;  %s1400_s5 = scalar_lea.hbm %s1451_s3, %s977_s28  ;;  %s1402_s29 = int_to_ptr.vmem [resolvable:$true] %s845_s29 }
  0x1a   : > { %v191_v25 = vsel %vm179_vm2, %v177_v20, 0.0  ;;  %v193_v27 = vsel %vm179_vm2, %v178_v23, 0.0  ;;  %1008 = vmatprep.subr.bf16.mxu1 %v1287_v33  ;;  %1020 = vmatprep.subr.bf16.mxu0 %v1292_v35  ;;  %vm481_vm10 = vsmask.f32 7424  ;;  %s1122_s16 = scalar_lea.vmem %s1402_s29, 1024  ;;  %p1129_p0 = scmp.lt.s32.totalorder %s1402_s29, %s1127_s8 }
  0x1b   : > { %v184_v18 = vadd.f32 %v183_v12, %v182_v14  ;;  %p1123_p11 = scmp.ne.s32.totalorder %s1402_s29, %s1122_s16  ;;  %p1130_p1 = scmp.lt.s32.totalorder %s1128_s9, %s1122_s16 }
  0x1d   : > { %v186_v21 = vadd.f32 %v185_v16, %v184_v18  ;;  %p1124_p12 = pnand %p1123_p11, %p1245_p5  ;;  %p1131_p2 = por %p1130_p1, %p1129_p0 }
  0x1f   : > { %v188_v24 = vadd.f32 %v187_v19, %v186_v21  ;;  %p1125_p13 = pneg %p1124_p12 }
  0x21   : > { %v190_v26 = vadd.f32 %v189_v22, %v188_v24  ;;  %p1132_p3 = pnand %p1131_p2, %p1125_p13 }
  0x23   : > { %v192_v28 = vadd.f32 %v191_v25, %v190_v26 }
  0x25   : > { %v194_v29 = vadd.f32 %v193_v27, %v192_v28 }
  0x27   : > { %v195_v30 = vrot.slane %v194_v29, 4 }
  0x29   : > { %v196_v31 = vadd.f32 %v195_v30, %v194_v29 }
  0x2b   : > { %v197_v32 = vrot.slane %v196_v31, 2 }
  0x2d   : > { %v198_v34 = vadd.f32 %v197_v32, %v196_v31 }
  0x2f   : > { %v199_v36 = vrot.slane %v198_v34, 1 }
  0x31   : > { %v200_v37 = vadd.f32 %v199_v36, %v198_v34 }
  0x33   : > { %v202_v38 = vmul.f32 0.015625, %v200_v37 }
  0x35   : > { %v203_v39 = vsub.f32 %v171_v6, %v202_v38  ;;  %v204_v40 = vsub.f32 %v172_v7, %v202_v38  ;;  %v205_v41 = vsub.f32 %v173_v8, %v202_v38  ;;  %v206_v42 = vsub.f32 %v174_v9, %v202_v38 }
  0x36   : > { %v207_v43 = vsub.f32 %v175_v13, %v202_v38  ;;  %v208_v44 = vsub.f32 %v176_v15, %v202_v38  ;;  %v209_v49 = vsub.f32 %v177_v20, %v202_v38  ;;  %v210_v55 = vsub.f32 %v178_v23, %v202_v38 }
  0x37   : > { %v211_v45 = vmul.f32 %v203_v39, %v203_v39  ;;  %v212_v46 = vmul.f32 %v204_v40, %v204_v40  ;;  %v213_v47 = vmul.f32 %v205_v41, %v205_v41  ;;  %v214_v48 = vmul.f32 %v206_v42, %v206_v42 }
  0x38   : > { %v215_v50 = vmul.f32 %v207_v43, %v207_v43  ;;  %v216_v56 = vmul.f32 %v208_v44, %v208_v44  ;;  %v217_v59 = vmul.f32 %v209_v49, %v209_v49  ;;  %v218_v62 = vmul.f32 %v210_v55, %v210_v55 }
  0x39   : > { %v219_v51 = vsel %vm179_vm2, %v211_v45, 0.0  ;;  %v220_v52 = vsel %vm179_vm2, %v212_v46, 0.0  ;;  %v222_v53 = vsel %vm179_vm2, %v213_v47, 0.0  ;;  %v224_v57 = vsel %vm179_vm2, %v214_v48, 0.0 }
  0x3a   : > { %v221_v54 = vadd.f32 %v220_v52, %v219_v51  ;;  %v226_v60 = vsel %vm179_vm2, %v215_v50, 0.0  ;;  %v228_v63 = vsel %vm179_vm2, %v216_v56, 0.0  ;;  %v230_v1 = vsel %vm179_vm2, %v217_v59, 0.0 }
  0x3b   : > { %v232_v4 = vsel %vm179_vm2, %v218_v62, 0.0 }
  0x3c   : > { %v223_v58 = vadd.f32 %v222_v53, %v221_v54 }
  0x3e   : > { %v225_v61 = vadd.f32 %v224_v57, %v223_v58 }
  0x40   : > { %v227_v0 = vadd.f32 %v226_v60, %v225_v61 }
  0x42   : > { %v229_v2 = vadd.f32 %v228_v63, %v227_v0 }
  0x44   : > { %v231_v5 = vadd.f32 %v230_v1, %v229_v2 }
  0x46   : > { %v233_v6 = vadd.f32 %v232_v4, %v231_v5 }
  0x48   : > { %v234_v7 = vrot.slane %v233_v6, 4 }
  0x4a   : > { %v235_v8 = vadd.f32 %v234_v7, %v233_v6 }
  0x4c   : > { %v236_v9 = vrot.slane %v235_v8, 2 }
  0x4e   : > { %v237_v10 = vadd.f32 %v236_v9, %v235_v8 }
  0x50   : > { %v238_v11 = vrot.slane %v237_v10, 1 }
  0x52   : > { %v239_v12 = vadd.f32 %v238_v11, %v237_v10 }
  0x54   : > { %v240_v13 = vmul.f32 0.015625, %v239_v12 }
  0x56   : > { %v241_v14 = vadd.f32 1e-05, %v240_v13 }
  0x58   : > { %1088 = vrsqrt.f32 %v241_v14 }
  0x65   : > { %v1089_v15 = vpop.eup %1088 }
  0x66   : > { %v243_v16 = vmul.f32 %v1089_v15, %v203_v39  ;;  %v244_v17 = vmul.f32 %v1089_v15, %v204_v40  ;;  %v245_v18 = vmul.f32 %v1089_v15, %v205_v41  ;;  %v246_v19 = vmul.f32 %v1089_v15, %v206_v42 }
  0x67   : > { %v247_v20 = vmul.f32 %v1089_v15, %v207_v43  ;;  %v1304_v21 = vmul.f32 %v1089_v15, %v208_v44  ;;  %v1306_v25 = vmul.f32 %v1089_v15, %v209_v49  ;;  %v1308_v27 = vmul.f32 %v1089_v15, %v210_v55 }
  0x68   : > { %v914_v22 = vmul.f32 -1.442695, %v243_v16  ;;  %v915_v23 = vmul.f32 -1.442695, %v244_v17  ;;  %v916_v24 = vmul.f32 -1.442695, %v245_v18 }
  0x69   : > { %v917_v26 = vmul.f32 -1.442695, %v246_v19  ;;  %v918_v28 = vmul.f32 -1.442695, %v247_v20  ;;  %v919_v29 = vmul.f32 -1.442695, %v1304_v21 }
  0x6a   : > { %1090 = vpow2.f32 %v914_v22  ;;  %v920_v30 = vmul.f32 -1.442695, %v1306_v25  ;;  %v921_v31 = vmul.f32 -1.442695, %v1308_v27 }
  0x6b   : > { %1092 = vpow2.f32 %v915_v23 }
  0x6c   : > { %1094 = vpow2.f32 %v916_v24 }
  0x6d   : > { %1096 = vpow2.f32 %v917_v26 }
  0x6e   : > { %1098 = vpow2.f32 %v918_v28 }
  0x6f   : > { %1100 = vpow2.f32 %v919_v29 }
  0x70   : > { %1102 = vpow2.f32 %v920_v30 }
  0x71   : > { %1104 = vpow2.f32 %v921_v31 }
  0x77   : > { %v1091_v32 = vpop.eup %1090 }
  0x78   : > { %v1093_v34 = vpop.eup %1092  ;;  %v275_v36 = vadd.f32 1.0, %v1091_v32 }
  0x79   : > { %v1095_v37 = vpop.eup %1094  ;;  %v276_v38 = vadd.f32 1.0, %v1093_v34 }
  0x7a   : > { %v1097_v39 = vpop.eup %1096  ;;  %v277_v40 = vadd.f32 1.0, %v1095_v37  ;;  %1106 = vrcp.f32 %v275_v36 }
  0x7b   : > { %v1099_v41 = vpop.eup %1098  ;;  %v278_v42 = vadd.f32 1.0, %v1097_v39  ;;  %1108 = vrcp.f32 %v276_v38 }
  0x7c   : > { %v1101_v43 = vpop.eup %1100  ;;  %1110 = vrcp.f32 %v277_v40  ;;  %v279_v44 = vadd.f32 1.0, %v1099_v41 }
  0x7d   : > { %v1103_v45 = vpop.eup %1102  ;;  %1112 = vrcp.f32 %v278_v42  ;;  %v280_v46 = vadd.f32 1.0, %v1101_v43 }
  0x7e   : > { %v1105_v47 = vpop.eup %1104  ;;  %v281_v48 = vadd.f32 1.0, %v1103_v45  ;;  %1114 = vrcp.f32 %v279_v44 }
  0x7f   : > { %v282_v49 = vadd.f32 1.0, %v1105_v47  ;;  %1116 = vrcp.f32 %v280_v46 }
  0x80   : > { %1118 = vrcp.f32 %v281_v48 }
  0x81   : > { %1120 = vrcp.f32 %v282_v49 }
  0x87   : > { %v1107_v50 = vpop.eup %1106 }
  0x88   : > { %v1109_v51 = vpop.eup %1108  ;;  %v299_v52 = vmul.f32 %v1107_v50, %v243_v16 }
  0x89   : > { %v1111_v53 = vpop.eup %1110  ;;  %v300_v54 = vmul.f32 %v1109_v51, %v244_v17  ;;  %v426_v17 = vld [vmem:[#allocation2] sm:$0xf] }
  0x8a   : > { %v1113_v55 = vpop.eup %1112  ;;  %v301_v56 = vmul.f32 %v1111_v53, %v245_v18  ;;  %v969_v57 = vpack.c.bf16 %v299_v52, %v299_v52 }
  0x8b   : > { %v1115_v58 = vpop.eup %1114  ;;  %v302_v59 = vmul.f32 %v1113_v55, %v246_v19  ;;  %v970_v60 = vpack.c.bf16 %v300_v54, %v300_v54 }
  0x8c   : > { %v1117_v61 = vpop.eup %1116  ;;  %v971_v62 = vpack.c.bf16 %v301_v56, %v301_v56  ;;  %v345_v63 = vshrl.u32 %v969_v57, 16  ;;  %v348_v0 = vshll.u32 %v969_v57, 16  ;;  %v303_v1 = vmul.f32 %v1115_v58, %v247_v20 }
  0x8d   : > { %v1119_v2 = vpop.eup %1118  ;;  %v972_v4 = vpack.c.bf16 %v302_v59, %v302_v59  ;;  %v353_v5 = vshrl.u32 %v970_v60, 16  ;;  %v356_v6 = vshll.u32 %v970_v60, 16  ;;  %v304_v7 = vmul.f32 %v1117_v61, %v1304_v21  ;;  %v437_v61 = vld [vmem:[#allocation2 + $0x20] sm:$0x1] }
  0x8e   : > { %v1121_v8 = vpop.eup %1120  ;;  %v347_v9 = vrot.slane %v345_v63, 7  ;;  %v362_v10 = vshrl.u32 %v971_v62, 16  ;;  %v365_v11 = vshll.u32 %v971_v62, 16  ;;  %v305_v12 = vmul.f32 %v1119_v2, %v1306_v25 }
  0x8f   : > { %v355_v13 = vrot.slane %v353_v5, 7  ;;  %v371_v14 = vshrl.u32 %v972_v4, 16  ;;  %v374_v15 = vshll.u32 %v972_v4, 16  ;;  %v306_v18 = vmul.f32 %v1121_v8, %v1308_v27 }
  0x90   : > { %v350_v20 = vor.u32 %v348_v0, %v347_v9  ;;  %v351_v21 = vrot.slane %v347_v9, 4  ;;  %v364_v22 = vrot.slane %v362_v10, 7  ;;  %v973_v23 = vpack.c.bf16 %v303_v1, %v303_v1 }
  0x91   : > { %v358_v24 = vor.u32 %v356_v6, %v355_v13  ;;  %v360_v25 = vrot.slane %v355_v13, 4  ;;  %v373_v26 = vrot.slane %v371_v14, 7  ;;  %v974_v28 = vpack.c.bf16 %v304_v7, %v304_v7 }
  0x92   : > { %v367_v29 = vor.u32 %v365_v11, %v364_v22  ;;  %v369_v30 = vrot.slane %v364_v22, 4  ;;  %v427_v31 = vsel %vm1317_vm8, %v350_v20, %v426_v17  ;;  %v975_v27 = vpack.c.bf16 %v305_v12, %v305_v12 }
  0x93   : > { %v359_v32 = vsel %vm1324_vm9, %v351_v21, %v358_v24  ;;  %v376_v34 = vor.u32 %v374_v15, %v373_v26  ;;  %428 = vst [vmem:[#allocation2] sm:$0xf] %v427_v31  ;;  %v976_v36 = vpack.c.bf16 %v306_v18, %v306_v18  ;;  %v380_v38 = vshrl.u32 %v973_v23, 16 }
  0x94   : > { %v368_v37 = vsel %vm1324_vm9, %v360_v25, %v367_v29  ;;  %430 = vst.msk [vmem:[#allocation2 + $0x4] sm:$0xf] %vm424_vm7, %v359_v32  ;;  %v383_v39 = vshll.u32 %v973_v23, 16  ;;  %v389_v40 = vshrl.u32 %v974_v28, 16  ;;  %v392_v42 = vshll.u32 %v974_v28, 16  ;;  %v1087_v28 = vld [vmem:[%s1449_s1 + $0x20] sm:$0xff]  }
  0x95   : > { %v377_v41 = vsel %vm1324_vm9, %v369_v30, %v376_v34  ;;  %431 = vst.msk [vmem:[#allocation2 + $0x8] sm:$0xf] %vm424_vm7, %v368_v37  ;;  %v398_v43 = vshrl.u32 %v975_v27, 16  ;;  %v401_v44 = vshll.u32 %v975_v27, 16  ;;  %v378_v45 = vrot.slane %v373_v26, 4 }
  0x96   : > { %432 = vst.msk [vmem:[#allocation2 + $0xc] sm:$0xf] %vm424_vm7, %v377_v41  ;;  %v382_v46 = vrot.slane %v380_v38, 7  ;;  %v391_v47 = vrot.slane %v389_v40, 7  ;;  %v407_v48 = vshrl.u32 %v976_v36, 16  ;;  %v410_v50 = vshll.u32 %v976_v36, 16 }
  0x97   : > { %v400_v49 = vrot.slane %v398_v43, 7  ;;  %v1086_v40 = vld [vmem:[%s1449_s1] sm:$0xff]  }
  0x98   : > { %v385_v51 = vor.u32 %v383_v39, %v382_v46  ;;  %v387_v52 = vrot.slane %v382_v46, 4  ;;  %v394_v53 = vor.u32 %v392_v42, %v391_v47  ;;  %v396_v54 = vrot.slane %v391_v47, 4 }
  0x99   : > { %v403_v55 = vor.u32 %v401_v44, %v400_v49  ;;  %v405_v56 = vrot.slane %v400_v49, 4  ;;  %v409_v57 = vrot.slane %v407_v48, 7 }
  0x9a   : > { %v440_v58 = vld [vmem:[#allocation2] sm:$0xf]  ;;  %v386_v59 = vsel %vm1324_vm9, %v378_v45, %v385_v51  ;;  %v395_v60 = vsel %vm1324_vm9, %v387_v52, %v394_v53 }
  0x9b   : > { %v441_v62 = vld [vmem:[#allocation2 + $0x4] sm:$0xf]  ;;  %v404_v63 = vsel %vm1324_vm9, %v396_v54, %v403_v55  ;;  %v412_v0 = vor.u32 %v410_v50, %v409_v57  ;;  %433 = vst.msk [vmem:[#allocation2 + $0x10] sm:$0xf] %vm424_vm7, %v386_v59  ;;  %434 = vst.msk [vmem:[#allocation2 + $0x14] sm:$0xf] %vm424_vm7, %v395_v60 }
  0x9c   : > { %v414_v1 = vrot.slane %v409_v57, 4  ;;  %v934_v2 = vcombine.low %v440_v58, %v441_v62  ;;  %435 = vst.msk [vmem:[#allocation2 + $0x18] sm:$0xf] %vm424_vm7, %v404_v63  ;;  %v692_v4 = vld [vmem:[#allocation2] sm:$0xe] }
  0x9d   : > { %v1080_v5 = vld [vmem:[#allocation2 + $0x8] sm:$0xff]   ;;  %v413_v6 = vsel %vm1324_vm9, %v405_v56, %v412_v0  ;;  %v955_v11 = vcombine.low %v692_v4, %v441_v62  ;;  %v962_v58 = vld [vmem:[%s1450_s2] ss:$0 sm:$0xff] }
  0x9e   : > { %v438_v7 = vsel %vm1265_vm3, %v414_v1, %v437_v61  ;;  %v483_v8 = vshrl.u32 %v934_v2, 16  ;;  %v485_v9 = vshll.u32 %v934_v2, 16  ;;  %436 = vst.msk [vmem:[#allocation2 + $0x1c] sm:$0xf] %vm424_vm7, %v413_v6  ;;  %v490_v10 = vshll.u32 %v1080_v5, 16 }
  0x9f   : > { %439 = vst [vmem:[#allocation2 + $0x20] sm:$0x1] %v438_v7  ;;  %v494_v13 = vshrl.u32 %v1080_v5, 16  ;;  %v702_v17 = vrot.slane %v955_v11, 1  ;;  %v703_v18 = vrot.slane %v1080_v5, 1 }
  0xa0   : > { %v487_v12 = vrot.slane %v485_v9, 1  ;;  %v492_v14 = vrot.slane %v490_v10, 1 }
  0xa1   : > { %v704_v29 = vsel %vm701_vm11, %v702_v17, %v703_v18 }
  0xa2   : > { %v488_v15 = vor.u32 %v487_v12, %v483_v8  ;;  %v1081_v16 = vld [vmem:[#allocation2 + $0x10] sm:$0xff]   ;;  %v496_v3 = vor.u32 %v494_v13, %v492_v14 }
  0xa3   : > { %v498_v20 = vshll.u32 %v1081_v16, 16  ;;  %v502_v21 = vshrl.u32 %v1081_v16, 16  ;;  %v705_v36 = vrot.slane %v1081_v16, 1 }
  0xa4   : > { %v493_v19 = vsel %vm481_vm10, %v488_v15, %v492_v14 }
  0xa5   : > { %1000 = vmatprep.mubr.msk.bf16.mxu0 %vm179_vm2, %v493_v19  ;;  %v1082_v22 = vld [vmem:[#allocation2 + $0x18] sm:$0xff]   ;;  %v500_v23 = vrot.slane %v498_v20, 1 }
  0xa6   : > { %v1084_v24 = vld [vmem:[#allocation2 + $0x20] ss:$0 sps:$4 sm:$0x11]   ;;  %v506_v25 = vshll.u32 %v1082_v22, 16  ;;  %v510_v26 = vshrl.u32 %v1082_v22, 16  ;;  %v707_v39 = vrot.slane %v1082_v22, 1 }
  0xa7   : > { %v504_v30 = vor.u32 %v502_v21, %v500_v23  ;;  %v501_v31 = vsel %vm481_vm10, %v496_v3, %v500_v23  ;;  %v514_v27 = vshll.u32 %v1084_v24, 16  ;;  %v709_v43 = vrot.slane %v1084_v24, 1 }
  0xa8   : > { %v508_v32 = vrot.slane %v506_v25, 1  ;;  %1001 = vmatmul.mubr.msk.bf16.vlgmr.msra.gmra.mxu0 %vm179_vm2, %v501_v31  ;;  %v708_v42 = vsel %vm701_vm11, %v705_v36, %v707_v39 }
  0xa9   : > { %v516_v34 = vrot.slane %v514_v27, 1  ;;  %1021 = vmatpush3.bf16.msra.mxu0 %v1292_v35  ;;  %1024 = vmatprep.mubr.msk.bf16.mxu0 %vm179_vm2, %v704_v29  ;;  %v706_v35 = vsel %vm701_vm11, %v703_v18, %v705_v36  ;;  %v710_v44 = vsel %vm701_vm11, %v707_v39, %v709_v43 }
  0xaa   : > { %v509_v37 = vsel %vm481_vm10, %v504_v30, %v508_v32  ;;  %v512_v38 = vor.u32 %v510_v26, %v508_v32  ;;  %1022 = vmatprep.subr.bf16.mxu0 %v1087_v28 }
  0xab   : > { %1004 = vmatprep.mubr.msk.bf16.mxu1 %vm179_vm2, %v509_v37 }
  0xac   : > { %v517_v41 = vsel %vm481_vm10, %v512_v38, %v516_v34 }
  0xad   : > { %1005 = vmatmul.mubr.msk.bf16.vlgmr.msra.gmra.mxu1 %vm179_vm2, %v517_v41  ;;  %1023 = vmatpush3.bf16.msra.mxu0 %v1087_v28 }
  0xae   : > { %1009 = vmatpush3.bf16.msra.mxu1 %v1287_v33  ;;  %1012 = vmatprep.mubr.msk.bf16.mxu1 %vm179_vm2, %v934_v2 }
  0xaf   : > { %1010 = vmatprep.subr.bf16.mxu1 %v1086_v40 }
  0xb0   : > { %1025 = vmatmul.mubr.msk.bf16.vlgmr.msra.gmra.mxu0 %vm179_vm2, %v706_v35 }
  0xb1   : > { %1028 = vmatprep.mubr.msk.bf16.mxu0 %vm179_vm2, %v708_v42 }
  0xb2   : > { %1011 = vmatpush3.bf16.msra.mxu1 %v1086_v40 }
  0xb5   : > { %1013 = vmatmul.mubr.msk.bf16.vlgmr.msra.gmra.mxu1 %vm179_vm2, %v1080_v5 }
  0xb6   : > { %1016 = vmatprep.mubr.msk.bf16.mxu1 %vm179_vm2, %v1081_v16 }
  0xb8   : > { %1029 = vmatmul.mubr.msk.bf16.gmra.mxu0 %vm179_vm2, %v710_v44 }
  0xbd   : > { %1017 = vmatmul.mubr.msk.bf16.gmra.mxu1 %vm179_vm2, %v1082_v22 }
 0x168   : > { %v1002_v33 = vpop.f32.mrf.mxu0 }
 0x16a   : > { %v576_v45 = vpop.f32.mrf.mxu0 }
 0x16c   : > { %v1003_v46 = vpop.f32.mrf.mxu0 }
 0x16d   : > { %v1006_v47 = vpop.f32.mrf.mxu1 }
 0x16e   : > { %v579_v48 = vpop.f32.mrf.mxu0 }
 0x16f   : > { %v592_v49 = vpop.f32.mrf.mxu1 }
 0x170   : > { %v1026_v50 = vpop.f32.mrf.mxu0 }
 0x171   : > { %v1007_v51 = vpop.f32.mrf.mxu1 }
 0x172   : > { %v769_v52 = vpop.f32.mrf.mxu0 }
 0x173   : > { %v595_v53 = vpop.f32.mrf.mxu1 }
 0x174   : > { %v1027_v54 = vpop.f32.mrf.mxu0 }
 0x175   : > { %v1014_v55 = vpop.f32.mrf.mxu1 }
 0x176   : > { %v670_v56 = vadd.f32 %v1014_v55, %v1002_v33  ;;  %v772_v57 = vpop.f32.mrf.mxu0 }
 0x177   : > { %v661_v59 = vpop.f32.mrf.mxu1 }
 0x178   : > { %v802_v60 = vadd.f32 %v1026_v50, %v670_v56  ;;  %v662_v61 = vadd.f32 %v661_v59, %v576_v45  ;;  %v1030_v62 = vpop.f32.mrf.mxu0 }
 0x179   : > { %v1015_v63 = vpop.f32.mrf.mxu1 }
 0x17a   : > { %v817_v0 = vadd.f32 %v962_v58, %v802_v60  ;;  %v800_v1 = vadd.f32 %v769_v52, %v662_v61  ;;  %v673_v2 = vadd.f32 %v1015_v63, %v1003_v46  ;;  %v785_v5 = vpop.f32.mrf.mxu0 }
 0x17b   : > { %v664_v4 = vpop.f32.mrf.mxu1 }
 0x17c   : > { %825 = vst [vmem:[%s1387_s27 + $0x10] sm:$0xff] %v817_v0  ;;  %v815_v6 = vadd.f32 %v962_v58, %v800_v1  ;;  %v803_v7 = vadd.f32 %v1027_v54, %v673_v2  ;;  %v665_v8 = vadd.f32 %v664_v4, %v579_v48  ;;  %v1031_v14 = vpop.f32.mrf.mxu0 }
 0x17d   : > { %v1018_v9 = vpop.f32.mrf.mxu1 }
 0x17e   : > { %823 = vst [vmem:[%s1387_s27] sm:$0xff] %v815_v6  ;;  %v818_v10 = vadd.f32 %v962_v58, %v803_v7  ;;  %v801_v11 = vadd.f32 %v772_v57, %v665_v8  ;;  %v686_v12 = vadd.f32 %v1018_v9, %v1006_v47  ;;  %v788_v22 = vpop.f32.mrf.mxu0 }
 0x17f   : > { %v677_v13 = vpop.f32.mrf.mxu1 }
 0x180   : > { %826 = vst [vmem:[%s1387_s27 + $0x18] sm:$0xff] %v818_v10  ;;  %v816_v15 = vadd.f32 %v962_v58, %v801_v11  ;;  %v806_v16 = vadd.f32 %v1030_v62, %v686_v12  ;;  %v678_v17 = vadd.f32 %v677_v13, %v592_v49 }
 0x181   : > { %v1019_v18 = vpop.f32.mrf.mxu1 }
 0x182   : > { %824 = vst [vmem:[%s1387_s27 + $0x8] sm:$0xff] %v816_v15  ;;  %v821_v19 = vadd.f32 %v962_v58, %v806_v16  ;;  %v804_v3 = vadd.f32 %v785_v5, %v678_v17  ;;  %v689_v20 = vadd.f32 %v1019_v18, %v1007_v51 }
 0x183   : > { %v680_v21 = vpop.f32.mrf.mxu1 }
 0x184   : > { %829 = vst [vmem:[%s1387_s27 + $0x30] sm:$0xff] %v821_v19  ;;  %v819_v23 = vadd.f32 %v962_v58, %v804_v3  ;;  %v807_v24 = vadd.f32 %v1031_v14, %v689_v20  ;;  %v681_v25 = vadd.f32 %v680_v21, %v595_v53 }
 0x186   : > { %827 = vst [vmem:[%s1387_s27 + $0x20] sm:$0xff] %v819_v23  ;;  %v822_v26 = vadd.f32 %v962_v58, %v807_v24  ;;  %v805_v28 = vadd.f32 %v788_v22, %v681_v25 }
 0x188   : > { %830 = vst [vmem:[%s1387_s27 + $0x38] sm:$0xff] %v822_v26  ;;  %v820_v29 = vadd.f32 %v962_v58, %v805_v28 }
 0x18a   : > { %828 = vst [vmem:[%s1387_s27 + $0x28] sm:$0xff] %v820_v29 }
 0x18b   : > { %1135 = shalt.err (!%p1132_p3)
}
 0x18c   : > { %s1136_s10 = scalar_lea.hbm %s1400_s5, 1024  ;;  %s1140_s19 = scalar_lea.hbm %s1451_s3, 2048 }
 0x18d   : > { %p1137_p4 = scmp.ne.s32.totalorder %s1400_s5, %s1136_s10  ;;  %p1141_p9 = scmp.lt.s32.totalorder %s1400_s5, %s1451_s3 }
 0x18e   : > { %p1142_p10 = scmp.lt.s32.totalorder %s1140_s19, %s1136_s10 }
 0x18f   : > { %p1138_p7 = pnand %p1137_p4, %p1245_p5 }
 0x190   : > { %p1143_p11 = por %p1142_p10, %p1141_p9 }
 0x191   : > { %p1139_p8 = pneg %p1138_p7 }
 0x193   : > { %p1144_p12 = pnand %p1143_p11, %p1139_p8 }
 0x195   : > { %1147 = shalt.err (!%p1144_p12)
}
 0x196   : > { %s1185_s25 = smov 128   ;;  %s1186_s26 = smov 8  }
 0x197   : > { %1036 = dma.vmem_to_hbm [thread:$0]  (%p1245_p5), %s1402_s29, 1024, %s1400_s5, %s1408_s6, %s1185_s25, %s1185_s25, %s1186_s26  }
 0x198 PF: > { %p1042_p13 = scmp.ge.s32.totalorder %s1182_s15, 2  ;;  %s860_s27 = sand.u32 1, %s1170_s12  }
 0x199   : > { %s861_s28 = scalar_lea.sflag [#allocation4], %s860_s27 }
 0x19a   : > { %p1039_p0 = pnand %p1042_p13, %p1249_p6 }
 0x19c   : > { %p1040_p1 = pneg %p1039_p0 }
 0x19e   : > { %1165 = dma.done.wait (%p1040_p1), %s861_s28, 1024  }
 0x19f   : > { %1167 = vsyncadd (%p1040_p1), %s861_s28, 4294966272  ;;  %p13_p2 = scmp.ge.s32.totalorder %s1232_s18, 4   ;;  %s1460_s12 = smov %s1174_s13 }
 0x1a0   : > { %s1461_s13 = smov %s1178_s14  ;;  %s1462_s14 = smov %s1243_s21 }
 0x1a1   : > { %s1463_s15 = smov %s1232_s18  ;;  %15 = sbr.rel (!%p13_p2) target bundleno = 3 (0x3), region = 69 }
 0x1a6   :  { %866 = vsyncpa [#allocation4], 1 }
 0x1a7   :  { %868 = vsyncpa [#allocation4 + $0x1], 1 }

</bundles_post_ra>
